<compile_context>
chip_gen: v6e
topology: v6e:2x2x1
jax: 0.10.0
libtpu: 0.0.40
codegen_flags: <defaults>
</compile_context>

<pallas_src>
import jax
import jax.numpy as jnp
from jax.experimental import pallas as pl
from jax.experimental.pallas import tpu as pltpu


def gru_kernel(xh_ref, h_ref, wg_ref, bg_ref, w_ref, u_ref, bu_ref, o_ref):
    Dp = h_ref.shape[-1]

    xh = xh_ref[...]            # (tm, 2*Dp) bf16 : [x | h] for the MXU
    h = h_ref[...]              # (tm, Dp)   f32  : exact h for r*h and blend

    # Fused gate matmul: [x|h] @ [[Wz, Wr], [Uz, Ur]]  ->  [x@Wz+h@Uz | x@Wr+h@Ur]
    gates = jnp.dot(xh, wg_ref[...], preferred_element_type=jnp.float32)
    gates = gates + bg_ref[...]
    zr = jax.nn.sigmoid(gates)                 # f32, (tm, 2*Dp)
    z = zr[:, :Dp]                             # lane-aligned split (Dp % 128 == 0)
    r = zr[:, Dp:]

    # Candidate hidden state: x @ W + (r*h) @ U + bu
    x_bf = xh[:, :Dp]                          # bf16 view of x
    rh_bf = (r * h).astype(jnp.bfloat16)       # f32 multiply, bf16 into the MXU
    pre = (jnp.dot(x_bf, w_ref[...], preferred_element_type=jnp.float32)
           + jnp.dot(rh_bf, u_ref[...], preferred_element_type=jnp.float32)
           + bu_ref[...])
    new_h = jnp.tanh(pre)                      # f32 (EUP)

    # (1 - z) * h + z * new_h  ==  h + z * (new_h - h)
    o_ref[...] = (h + z * (new_h - h)).astype(o_ref.dtype)


def gru_forward(x, h, params, *, tm=None):
    """x: (N, D) activations, h: (N, D) hidden. Returns (N, D) new hidden."""
    N, D = x.shape
    assert h.shape == (N, D)
    wz, uz, bz, wr, ur, br, w, u, bu = params

    # Pad feature dim to a lane-dense multiple of 128.
    Dp = ((D + 127) // 128) * 128
    pad_c = Dp - D

    def pad_mat(m):
        return jnp.pad(m, ((0, pad_c), (0, pad_c)))

    def pad_vec(v):
        return jnp.pad(v, (0, pad_c))

    x_p = jnp.pad(x, ((0, 0), (0, pad_c))).astype(jnp.float32)
    h_p = jnp.pad(h, ((0, 0), (0, pad_c))).astype(jnp.float32)

    # Fused gate weights / biases. (In production these would be pre-packed once.)
    wg = jnp.concatenate(
        [jnp.concatenate([pad_mat(wz), pad_mat(wr)], axis=1),
         jnp.concatenate([pad_mat(uz), pad_mat(ur)], axis=1)],
        axis=0).astype(jnp.bfloat16)                         # (2Dp, 2Dp)
    bg = jnp.concatenate([pad_vec(bz), pad_vec(br)]).reshape(1, 2 * Dp)  # f32

    w_b = pad_mat(w).astype(jnp.bfloat16)                    # (Dp, Dp)
    u_b = pad_mat(u).astype(jnp.bfloat16)                    # (Dp, Dp)
    bu2 = pad_vec(bu).reshape(1, Dp).astype(jnp.float32)

    # Fused activation operand [x | h] in bf16 for the MXU.
    xh = jnp.concatenate([x_p, h_p], axis=1).astype(jnp.bfloat16)        # (N, 2Dp)

    # Batch tiling: big tiles, few grid steps.
    if tm is None:
        tm = N if N <= 512 else 512
    assert N % tm == 0, "N must be divisible by the batch tile tm"
    grid = (N // tm,)

    xh_spec = pl.BlockSpec((tm, 2 * Dp), lambda i: (i, 0))
    h_spec = pl.BlockSpec((tm, Dp), lambda i: (i, 0))
    wg_spec = pl.BlockSpec((2 * Dp, 2 * Dp), lambda i: (0, 0))
    bg_spec = pl.BlockSpec((1, 2 * Dp), lambda i: (0, 0))
    mat_spec = pl.BlockSpec((Dp, Dp), lambda i: (0, 0))
    bu_spec = pl.BlockSpec((1, Dp), lambda i: (0, 0))
    out_spec = pl.BlockSpec((tm, Dp), lambda i: (i, 0))

    flops = 2 * N * ((2 * Dp) * (2 * Dp) + Dp * Dp + Dp * Dp)   # 3 fused dots
    transcendentals = 3 * N * Dp                                # 2x sigmoid + tanh
    bytes_accessed = (xh.size * 2 + h_p.size * 4 + N * Dp * 4   # acts in + out
                      + wg.size * 2 + w_b.size * 2 + u_b.size * 2
                      + bg.size * 4 + bu2.size * 4)

    out_p = pl.pallas_call(
        gru_kernel,
        out_shape=jax.ShapeDtypeStruct((N, Dp), x.dtype),
        grid_spec=pltpu.PrefetchScalarGridSpec(
            num_scalar_prefetch=0,
            grid=grid,
            in_specs=[xh_spec, h_spec, wg_spec, bg_spec, mat_spec, mat_spec,
                      bu_spec],
            out_specs=out_spec,
        ),
        compiler_params=pltpu.CompilerParams(
            dimension_semantics=("parallel",)),
        cost_estimate=pl.CostEstimate(
            flops=int(flops),
            transcendentals=int(transcendentals),
            bytes_accessed=int(bytes_accessed)),
    )(xh, h_p, wg, bg, w_b, u_b, bu2)

    return out_p[:, :D]


def gru_reference(x, h, params, *, mxu_dtype=jnp.float32):
    """Reference GRU. With mxu_dtype=bf16 it mirrors the kernel's matmul inputs
    (bf16 operands, f32 accumulation) while keeping everything else f32."""
    wz, uz, bz, wr, ur, br, w, u, bu = params

    def mm(a, b):
        return jnp.dot(a.astype(mxu_dtype), b.astype(mxu_dtype),
                       preferred_element_type=jnp.float32)

    z = jax.nn.sigmoid(mm(x, wz) + mm(h, uz) + bz)
    r = jax.nn.sigmoid(mm(x, wr) + mm(h, ur) + br)
    nh = jnp.tanh(mm(x, w) + mm(r * h, u) + bu)
    return (1.0 - z) * h + z * nh


if __name__ == "__main__":
    key = jax.random.PRNGKey(0)
    N, D = 16, 64   # batch, in_size == out_size (required by the torch forward)

    keys = jax.random.split(key, 11)
    # torch.rand -> uniform [0, 1); reset_parameters() is a no-op.
    wz = jax.random.uniform(keys[0], (D, D), jnp.float32)
    uz = jax.random.uniform(keys[1], (D, D), jnp.float32)
    bz = jax.random.uniform(keys[2], (D,), jnp.float32)
    wr = jax.random.uniform(keys[3], (D, D), jnp.float32)
    ur = jax.random.uniform(keys[4], (D, D), jnp.float32)
    br = jax.random.uniform(keys[5], (D,), jnp.float32)
    w = jax.random.uniform(keys[6], (D, D), jnp.float32)
    u = jax.random.uniform(keys[7], (D, D), jnp.float32)
    bu = jax.random.uniform(keys[8], (D,), jnp.float32)
    params = (wz, uz, bz, wr, ur, br, w, u, bu)

    x = jax.random.uniform(keys[9], (N, D), jnp.float32)
    h = jax.random.uniform(keys[10], (N, D), jnp.float32)

    out = gru_forward(x, h, params)
    out = jax.block_until_ready(out)
    assert out.shape == (N, D) and out.dtype == jnp.float32

    # Tight check against a reference that mirrors the kernel math (bf16 MXU
    # operands, f32 accumulation / activations / blend).
    ref_bf16 = gru_reference(x, h, params, mxu_dtype=jnp.bfloat16)
    assert jnp.allclose(out, ref_bf16, atol=2e-3, rtol=2e-3)

    # Sanity check against the pure-f32 reference (bf16 matmul rounding only).
    ref_f32 = gru_reference(x, h, params, mxu_dtype=jnp.float32)
    assert jnp.allclose(out, ref_f32, atol=5e-2, rtol=5e-2)

    print("KERNEL_OK")
</pallas_src>

<mosaic_0001>
module attributes {stable_mosaic.version = 11 : i64} {
  func.func @gru_kernel(%arg0: i32, %arg1: memref<16x256xbf16, #tpu.memory_space<vmem>>, %arg2: memref<16x128xf32, #tpu.memory_space<vmem>>, %arg3: memref<256x256xbf16, #tpu.memory_space<vmem>>, %arg4: memref<1x256xf32, #tpu.memory_space<vmem>>, %arg5: memref<128x128xbf16, #tpu.memory_space<vmem>>, %arg6: memref<128x128xbf16, #tpu.memory_space<vmem>>, %arg7: memref<1x128xf32, #tpu.memory_space<vmem>>, %arg8: memref<16x128xf32, #tpu.memory_space<vmem>>) attributes {dimension_semantics = [#tpu.dimension_semantics<parallel>], iteration_bounds = array<i64: 1>, scalar_prefetch = 0 : i64, scratch_operands = 0 : i64, tpu.core_type = #tpu.core_type<tc>, window_params = [{transform_indices = @transform_0, window_bounds = array<i64: 16, 256>}, {transform_indices = @transform_1, window_bounds = array<i64: 16, 128>}, {pipeline_mode = #tpu.pipeline_mode<synchronous>, transform_indices = @transform_2, window_bounds = array<i64: 256, 256>}, {pipeline_mode = #tpu.pipeline_mode<synchronous>, transform_indices = @transform_3, window_bounds = array<i64: 1, 256>}, {pipeline_mode = #tpu.pipeline_mode<synchronous>, transform_indices = @transform_4, window_bounds = array<i64: 128, 128>}, {pipeline_mode = #tpu.pipeline_mode<synchronous>, transform_indices = @transform_5, window_bounds = array<i64: 128, 128>}, {pipeline_mode = #tpu.pipeline_mode<synchronous>, transform_indices = @transform_6, window_bounds = array<i64: 1, 128>}, {transform_indices = @transform_7, window_bounds = array<i64: 16, 128>}]} {
    %c0 = arith.constant 0 : index
    %c0_0 = arith.constant 0 : index
    %0 = vector.load %arg1[%c0, %c0_0] : memref<16x256xbf16, #tpu.memory_space<vmem>>, vector<16x256xbf16>
    %c0_1 = arith.constant 0 : index
    %c0_2 = arith.constant 0 : index
    %1 = vector.load %arg2[%c0_1, %c0_2] : memref<16x128xf32, #tpu.memory_space<vmem>>, vector<16x128xf32>
    %c0_3 = arith.constant 0 : index
    %c0_4 = arith.constant 0 : index
    %2 = vector.load %arg3[%c0_3, %c0_4] : memref<256x256xbf16, #tpu.memory_space<vmem>>, vector<256x256xbf16>
    %cst = arith.constant dense<0.000000e+00> : vector<16x256xf32>
    %3 = tpu.matmul %0, %2, %cst {dimension_numbers = #tpu.dot_dimension_numbers<[1], [0], [0], [1], [0, 0, 1, 1], [], []>} : vector<16x256xbf16>, vector<256x256xbf16>, vector<16x256xf32> -> vector<16x256xf32>
    %c0_5 = arith.constant 0 : index
    %c0_6 = arith.constant 0 : index
    %4 = vector.load %arg4[%c0_5, %c0_6] : memref<1x256xf32, #tpu.memory_space<vmem>>, vector<1x256xf32>
    %5 = vector.broadcast %4 : vector<1x256xf32> to vector<16x256xf32>
    %6 = arith.addf %3, %5 : vector<16x256xf32>
    %7 = arith.negf %6 : vector<16x256xf32>
    %8 = math.exp %7 : vector<16x256xf32>
    %cst_7 = arith.constant 1.000000e+00 : f32
    %9 = vector.broadcast %cst_7 : f32 to vector<16x256xf32>
    %10 = arith.addf %9, %8 : vector<16x256xf32>
    %11 = arith.divf %9, %10 : vector<16x256xf32>
    %12 = vector.extract_strided_slice %11 {offsets = [0, 0], sizes = [16, 128], strides = [1, 1]} : vector<16x256xf32> to vector<16x128xf32>
    %13 = vector.extract_strided_slice %11 {offsets = [0, 128], sizes = [16, 128], strides = [1, 1]} : vector<16x256xf32> to vector<16x128xf32>
    %14 = vector.extract_strided_slice %0 {offsets = [0, 0], sizes = [16, 128], strides = [1, 1]} : vector<16x256xbf16> to vector<16x128xbf16>
    %15 = arith.mulf %13, %1 : vector<16x128xf32>
    %16 = arith.truncf %15 : vector<16x128xf32> to vector<16x128xbf16>
    %c0_8 = arith.constant 0 : index
    %c0_9 = arith.constant 0 : index
    %17 = vector.load %arg5[%c0_8, %c0_9] : memref<128x128xbf16, #tpu.memory_space<vmem>>, vector<128x128xbf16>
    %cst_10 = arith.constant dense<0.000000e+00> : vector<16x128xf32>
    %18 = tpu.matmul %14, %17, %cst_10 {dimension_numbers = #tpu.dot_dimension_numbers<[1], [0], [0], [1], [0, 0, 1, 1], [], []>} : vector<16x128xbf16>, vector<128x128xbf16>, vector<16x128xf32> -> vector<16x128xf32>
    %c0_11 = arith.constant 0 : index
    %c0_12 = arith.constant 0 : index
    %19 = vector.load %arg6[%c0_11, %c0_12] : memref<128x128xbf16, #tpu.memory_space<vmem>>, vector<128x128xbf16>
    %cst_13 = arith.constant dense<0.000000e+00> : vector<16x128xf32>
    %20 = tpu.matmul %16, %19, %cst_13 {dimension_numbers = #tpu.dot_dimension_numbers<[1], [0], [0], [1], [0, 0, 1, 1], [], []>} : vector<16x128xbf16>, vector<128x128xbf16>, vector<16x128xf32> -> vector<16x128xf32>
    %21 = arith.addf %18, %20 : vector<16x128xf32>
    %c0_14 = arith.constant 0 : index
    %c0_15 = arith.constant 0 : index
    %22 = vector.load %arg7[%c0_14, %c0_15] : memref<1x128xf32, #tpu.memory_space<vmem>>, vector<1x128xf32>
    %23 = vector.broadcast %22 : vector<1x128xf32> to vector<16x128xf32>
    %24 = arith.addf %21, %23 : vector<16x128xf32>
    %25 = math.tanh %24 : vector<16x128xf32>
    %26 = arith.subf %25, %1 : vector<16x128xf32>
    %27 = arith.mulf %12, %26 : vector<16x128xf32>
    %28 = arith.addf %1, %27 : vector<16x128xf32>
    %c0_16 = arith.constant 0 : index
    %c0_17 = arith.constant 0 : index
    %29 = vector.load %arg8[%c0_16, %c0_17] : memref<16x128xf32, #tpu.memory_space<vmem>>, vector<16x128xf32>
    tpu.vector_store %arg8[%c0_16, %c0_17], %28 {strides = array<i32>} : memref<16x128xf32, #tpu.memory_space<vmem>>, vector<16x128xf32>,
    return
  }
  func.func @transform_0(%arg0: i32) -> (i32, i32) {
    %c0_i32 = arith.constant 0 : i32
    %c0_i32_0 = arith.constant 0 : i32
    return %arg0, %c0_i32 : i32, i32
  }
  func.func @transform_1(%arg0: i32) -> (i32, i32) {
    %c0_i32 = arith.constant 0 : i32
    %c0_i32_0 = arith.constant 0 : i32
    return %arg0, %c0_i32 : i32, i32
  }
  func.func @transform_2(%arg0: i32) -> (i32, i32) {
    %c0_i32 = arith.constant 0 : i32
    %c0_i32_0 = arith.constant 0 : i32
    %c0_i32_1 = arith.constant 0 : i32
    return %c0_i32, %c0_i32_0 : i32, i32
  }
  func.func @transform_3(%arg0: i32) -> (i32, i32) {
    %c0_i32 = arith.constant 0 : i32
    %c0_i32_0 = arith.constant 0 : i32
    %c0_i32_1 = arith.constant 0 : i32
    return %c0_i32, %c0_i32_0 : i32, i32
  }
  func.func @transform_4(%arg0: i32) -> (i32, i32) {
    %c0_i32 = arith.constant 0 : i32
    %c0_i32_0 = arith.constant 0 : i32
    %c0_i32_1 = arith.constant 0 : i32
    return %c0_i32, %c0_i32_0 : i32, i32
  }
  func.func @transform_5(%arg0: i32) -> (i32, i32) {
    %c0_i32 = arith.constant 0 : i32
    %c0_i32_0 = arith.constant 0 : i32
    %c0_i32_1 = arith.constant 0 : i32
    return %c0_i32, %c0_i32_0 : i32, i32
  }
  func.func @transform_6(%arg0: i32) -> (i32, i32) {
    %c0_i32 = arith.constant 0 : i32
    %c0_i32_0 = arith.constant 0 : i32
    %c0_i32_1 = arith.constant 0 : i32
    return %c0_i32, %c0_i32_0 : i32, i32
  }
  func.func @transform_7(%arg0: i32) -> (i32, i32) {
    %c0_i32 = arith.constant 0 : i32
    %c0_i32_0 = arith.constant 0 : i32
    return %arg0, %c0_i32 : i32, i32
  }
}

</mosaic_0001>

<bundles_post_ra>
// kernel: tpu_custom_call.1
= control target key start
LH: loop header
LB: loop body
LE: loop exit
PB: predicated region body
PF: predicated region fallthrough
CT: control target
= control target key end

     0   :  { %12 = vsyncpa [#allocation3], 0  ;;  %s1100_s0 = inlined_call_operand.hbm [shape: bf16[16,256], index: 0, kind: input, shape index: {}]   ;;  %s1101_s1 = inlined_call_operand.hbm [shape: f32[16,128], index: 1, kind: input, shape index: {}]   ;;  %s1102_s2 = inlined_call_operand.hbm [shape: bf16[256,256], index: 2, kind: input, shape index: {}]   ;;  %s1103_s3 = inlined_call_operand.vmem [shape: f32[1,256], index: 3, kind: input, shape index: {}]   ;;  %s1104_s4 = inlined_call_operand.hbm [shape: bf16[128,128], index: 4, kind: input, shape index: {}]   ;;  %s1105_s5 = inlined_call_operand.hbm [shape: bf16[128,128], index: 5, kind: input, shape index: {}]   ;;  %s1106_s6 = inlined_call_operand.vmem [shape: f32[1,128], index: 6, kind: input, shape index: {}]   ;;  %s1107_s7 = inlined_call_operand.hbm [shape: f32[16,128], index: 7, kind: output, shape index: {}]  }
   0x1   :  { %13 = vsyncpa [#allocation6], 0 }
   0x2   :  { %14 = vsyncpa [#allocation9], 0 }
   0x3   :  { %15 = vsyncpa [#allocation4], 0  ;;  %s972_s24 = smov [#allocation5]   ;;  %s973_s26 = smov [#allocation8]  }
   0x4   :  { %s33_s25 = sshll.u32 %s972_s24, 4  ;;  %s59_s27 = sshll.u32 %s973_s26, 4  ;;  %s34_s25 = int_to_ptr.vmem [resolvable:$true] %s33_s25  ;;  %s60_s27 = int_to_ptr.vmem [resolvable:$true] %s59_s27 }
   0x5   :  { %s852_s28 = scalar_lea.vmem %s34_s25, 256  ;;  %p857_p1 = scmp.lt.s32.totalorder %s34_s25, %s34_s25 }
   0x6   :  { %p853_p0 = scmp.ne.s32.totalorder %s34_s25, %s852_s28  ;;  %p858_p2 = scmp.lt.s32.totalorder %s852_s28, %s852_s28 }
   0x8   :  { %p859_p3 = por %p858_p2, %p857_p1 }
   0xa   :  { %p860_p4 = pnand %p859_p3, %p853_p0 }
   0xc   :  { %863 = shalt.err (!%p860_p4)
}
   0xd   :  { %s974_s29 = smov 128   ;;  %s975_s30 = smov 8  }
   0xe   :  { %39 = dma.hbm_to_vmem [thread:$0]  %s1101_s1, 256, %s34_s25, [#allocation6], %s974_s29, %s974_s29, %s975_s30  }
   0xf   :  { %s872_s10 = scalar_lea.vmem %s60_s27, 1024  ;;  %p877_p6 = scmp.lt.s32.totalorder %s60_s27, %s60_s27 }
  0x10   :  { %p873_p5 = scmp.ne.s32.totalorder %s60_s27, %s872_s10  ;;  %p878_p7 = scmp.lt.s32.totalorder %s872_s10, %s872_s10 }
  0x12   :  { %p879_p8 = por %p878_p7, %p877_p6 }
  0x14   :  { %p880_p9 = pnand %p879_p8, %p873_p5 }
  0x16   :  { %883 = shalt.err (!%p880_p9)
}
  0x17   :  { %s976_s11 = smov 64   ;;  %s977_s12 = smov 4  }
  0x18   :  { %65 = dma.hbm_to_vmem [thread:$0]  %s1104_s4, 1024, %s60_s27, [#allocation9], %s976_s11, %s976_s11, %s977_s12  }
  0x19   :  { %s978_s15 = smov [#allocation2]   ;;  %s979_s17 = smov [#allocation7]  }
  0x1a   :  { %s21_s16 = sshll.u32 %s978_s15, 4  ;;  %s45_s1 = sshll.u32 %s979_s17, 4  ;;  %s22_s16 = int_to_ptr.vmem [resolvable:$true] %s21_s16  ;;  %s46_s1 = int_to_ptr.vmem [resolvable:$true] %s45_s1 }
  0x1b   :  { %s892_s18 = scalar_lea.vmem %s22_s16, 256  ;;  %p897_p11 = scmp.lt.s32.totalorder %s22_s16, %s22_s16 }
  0x1c   :  { %p893_p10 = scmp.ne.s32.totalorder %s22_s16, %s892_s18  ;;  %p898_p12 = scmp.lt.s32.totalorder %s892_s18, %s892_s18 }
  0x1e   :  { %p899_p13 = por %p898_p12, %p897_p11 }
  0x20   :  { %p900_p0 = pnand %p899_p13, %p893_p10 }
  0x22   :  { %903 = shalt.err (!%p900_p0)
}
  0x23   :  { %27 = dma.hbm_to_vmem [thread:$0]  %s1100_s0, 256, %s22_s16, [#allocation3], %s974_s29, %s974_s29, %s975_s30  }
  0x24   :  { %s912_s4 = scalar_lea.vmem %s46_s1, 4096  ;;  %p917_p2 = scmp.lt.s32.totalorder %s46_s1, %s46_s1 }
  0x25   :  { %p913_p1 = scmp.ne.s32.totalorder %s46_s1, %s912_s4  ;;  %p918_p3 = scmp.lt.s32.totalorder %s912_s4, %s912_s4 }
  0x27   :  { %p919_p4 = por %p918_p3, %p917_p2 }
  0x29   :  { %p920_p5 = pnand %p919_p4, %p913_p1 }
  0x2b   :  { %923 = shalt.err (!%p920_p5)
}
  0x2c   :  { %51 = dma.hbm_to_vmem [thread:$0]  %s1102_s2, 4096, %s46_s1, [#allocation6], %s974_s29, %s974_s29, %s975_s30  }
  0x2d   :  { %s980_s23 = smov [#allocation10]  }
  0x2e   :  { %s71_s24 = sshll.u32 %s980_s23, 4  ;;  %s72_s24 = int_to_ptr.vmem [resolvable:$true] %s71_s24 }
  0x2f   :  { %s932_s25 = scalar_lea.vmem %s72_s24, 1024  ;;  %p937_p7 = scmp.lt.s32.totalorder %s72_s24, %s72_s24 }
  0x30   :  { %p933_p6 = scmp.ne.s32.totalorder %s72_s24, %s932_s25  ;;  %p938_p8 = scmp.lt.s32.totalorder %s932_s25, %s932_s25 }
  0x32   :  { %p939_p9 = por %p938_p8, %p937_p7 }
  0x34   :  { %p940_p10 = pnand %p939_p9, %p933_p6 }
  0x36   :  { %943 = shalt.err (!%p940_p10)
}
  0x37   :  { %77 = dma.hbm_to_vmem [thread:$0]  %s1105_s5, 1024, %s72_s24, [#allocation9], %s976_s11, %s976_s11, %s977_s12  }
  0x38   :  { %964 = dma.done.wait [#allocation3], 256  }
  0x39   :  { %965 = vsyncadd [#allocation3], 4294967040 }
  0x3a   :  { %966 = dma.done.wait [#allocation6], 4352  }
  0x3b   :  { %967 = vsyncadd [#allocation6], 4294962944 }
  0x3c   :  { %968 = dma.done.wait [#allocation9], 2048  }
  0x3d   :  { %969 = vsyncadd [#allocation9], 4294965248  ;;  %v757_v0 = vld [vmem:[#allocation7 + $0x74] ss:$8 sps:$4 sm:$0xff]   ;;  %v759_v1 = vld [vmem:[#allocation7 + $0x70] ss:$8 sps:$4 sm:$0xff]   ;;  %v134_v43 = vlaneseq }
  0x3e   :  { %314 = vmatprep.subr.bf16.mxu0 %v757_v0  ;;  %v760_v2 = vld [vmem:[#allocation7 + $0x64] ss:$8 sps:$4 sm:$0xff]   ;;  %v762_v3 = vld [vmem:[#allocation7 + $0x60] ss:$8 sps:$4 sm:$0xff]   ;;  %v763_v4 = vld [vmem:[#allocation7 + $0x54] ss:$8 sps:$4 sm:$0xff]  }
  0x3f   :  { %315 = vmatpush1.bf16.msra.mxu0 %v759_v1  ;;  %v765_v5 = vld [vmem:[#allocation7 + $0x50] ss:$8 sps:$4 sm:$0xff]   ;;  %v766_v6 = vld [vmem:[#allocation7 + $0x44] ss:$8 sps:$4 sm:$0xff]   ;;  %v768_v7 = vld [vmem:[#allocation7 + $0x40] ss:$8 sps:$4 sm:$0xff]  }
  0x40   :  { %316 = vmatprep.subr.bf16.mxu0 %v760_v2  ;;  %v769_v8 = vld [vmem:[#allocation7 + $0x34] ss:$8 sps:$4 sm:$0xff]   ;;  %v771_v9 = vld [vmem:[#allocation7 + $0x30] ss:$8 sps:$4 sm:$0xff]   ;;  %v772_v10 = vld [vmem:[#allocation7 + $0x24] ss:$8 sps:$4 sm:$0xff]  }
  0x41   :  { %v774_v11 = vld [vmem:[#allocation7 + $0x20] ss:$8 sps:$4 sm:$0xff]   ;;  %v775_v12 = vld [vmem:[#allocation7 + $0x14] ss:$8 sps:$4 sm:$0xff]   ;;  %v777_v13 = vld [vmem:[#allocation7 + $0x10] ss:$8 sps:$4 sm:$0xff]  }
  0x42   :  { %v778_v14 = vld [vmem:[#allocation7 + $0x4] ss:$8 sps:$4 sm:$0xff]   ;;  %v780_v16 = vld [vmem:[#allocation7] ss:$8 sps:$4 sm:$0xff]   ;;  %v781_v17 = vld [vmem:[#allocation7 + $0xf4] ss:$8 sps:$4 sm:$0xff]  }
  0x43   :  { %317 = vmatpush1.bf16.msra.mxu0 %v762_v3  ;;  %v807_v15 = vld [vmem:[#allocation2 + $0x4] ss:$8 sps:$4 sm:$0xff]   ;;  %v783_v18 = vld [vmem:[#allocation7 + $0xf0] ss:$8 sps:$4 sm:$0xff]   ;;  %v786_v20 = vld [vmem:[#allocation7 + $0xe0] ss:$8 sps:$4 sm:$0xff]  }
  0x44   :  { %318 = vmatprep.subr.bf16.mxu0 %v763_v4  ;;  %346 = vmatprep.mubr.bf16.mxu0 %v807_v15  ;;  %v784_v19 = vld [vmem:[#allocation7 + $0xe4] ss:$8 sps:$4 sm:$0xff]   ;;  %v787_v21 = vld [vmem:[#allocation7 + $0xd4] ss:$8 sps:$4 sm:$0xff]   ;;  %v789_v22 = vld [vmem:[#allocation7 + $0xd0] ss:$8 sps:$4 sm:$0xff]  }
  0x45   :  { %v790_v23 = vld [vmem:[#allocation7 + $0xc4] ss:$8 sps:$4 sm:$0xff]   ;;  %v792_v24 = vld [vmem:[#allocation7 + $0xc0] ss:$8 sps:$4 sm:$0xff]   ;;  %v793_v25 = vld [vmem:[#allocation7 + $0xb4] ss:$8 sps:$4 sm:$0xff]  }
  0x46   :  { %v795_v26 = vld [vmem:[#allocation7 + $0xb0] ss:$8 sps:$4 sm:$0xff]   ;;  %v796_v27 = vld [vmem:[#allocation7 + $0xa4] ss:$8 sps:$4 sm:$0xff]   ;;  %v798_v28 = vld [vmem:[#allocation7 + $0xa0] ss:$8 sps:$4 sm:$0xff]  }
  0x47   :  { %319 = vmatpush1.bf16.msra.mxu0 %v765_v5  ;;  %v799_v29 = vld [vmem:[#allocation7 + $0x94] ss:$8 sps:$4 sm:$0xff]   ;;  %v801_v30 = vld [vmem:[#allocation7 + $0x90] ss:$8 sps:$4 sm:$0xff]   ;;  %v802_v31 = vld [vmem:[#allocation7 + $0x84] ss:$8 sps:$4 sm:$0xff]  }
  0x48   :  { %320 = vmatprep.subr.bf16.mxu0 %v766_v6  ;;  %v804_v32 = vld [vmem:[#allocation7 + $0x80] ss:$8 sps:$4 sm:$0xff]   ;;  %v808_v34 = vld [vmem:[#allocation10 + $0x38] sm:$0xff]   ;;  %v981_v35 = vmov 0.0   ;;  %v809_v36 = vld [vmem:[#allocation10 + $0x30] sm:$0xff]   ;;  %vm982_vm0 = vmmov 0  }
  0x49   :  { %v1054_v33 = vld [vmem:[#allocation2] ss:$8 sps:$4 sm:$0xff]   ;;  %705 = vmatprep.subr.bf16.mxu1 %v981_v35  ;;  %v812_v39 = vld [vmem:[#allocation10 + $0x18] sm:$0xff]   ;;  %721 = vmatprep.mubr.msk.bf16.mxu1 %vm982_vm0, %v981_v35  ;;  %v813_v40 = vld [vmem:[#allocation10 + $0x10] sm:$0xff]   ;;  %v135_v44 = vshrl.u32 %v134_v43, 7 }
  0x4a   :  { %706 = vmatpush3.bf16.msra.mxu1 %v808_v34  ;;  %v810_v37 = vld [vmem:[#allocation10 + $0x28] sm:$0xff]   ;;  %v811_v38 = vld [vmem:[#allocation10 + $0x20] sm:$0xff]   ;;  %v1071_v61 = vld [vmem:[#allocation5] sm:$0xff] }
  0x4b   :  { %321 = vmatpush1.bf16.msra.mxu0 %v768_v7  ;;  %707 = vmatprep.subr.bf16.mxu1 %v981_v35  ;;  %v814_v41 = vld [vmem:[#allocation10 + $0x8] sm:$0xff]   ;;  %v815_v42 = vld [vmem:[#allocation10] sm:$0xff]   ;;  %v140_v45 = vsub.s32 1, %v135_v44  ;;  %v1073_v62 = vld [vmem:[#allocation5 + $0x8] sm:$0xff] }
  0x4c   :  { %322 = vmatprep.subr.bf16.mxu0 %v769_v8  ;;  %v132_v46 = vld [vmem:[%s1103_s3] sm:$0x3]  ;;  %v816_v2 = vld [vmem:[#allocation8 + $0x38] sm:$0xff]   ;;  %v817_v4 = vld [vmem:[#allocation8 + $0x30] sm:$0xff]  }
  0x4d   :  { %v141_v47 = vrot.slane %v132_v46, %v140_v45  ;;  %v818_v5 = vld [vmem:[#allocation8 + $0x28] sm:$0xff]   ;;  %v819_v6 = vld [vmem:[#allocation8 + $0x20] sm:$0xff]   ;;  %v820_v7 = vld [vmem:[#allocation8 + $0x18] sm:$0xff]  }
  0x4e   :  { %708 = vmatpush3.bf16.msra.mxu1 %v809_v36  ;;  %v821_v8 = vld [vmem:[#allocation8 + $0x10] sm:$0xff]  }
  0x4f   :  { %323 = vmatpush1.bf16.msra.mxu0 %v771_v9  ;;  %709 = vmatprep.subr.bf16.mxu1 %v981_v35  ;;  %v822_v9 = vld [vmem:[#allocation8 + $0x8] sm:$0xff]  }
  0x50   :  { %324 = vmatprep.subr.bf16.mxu0 %v772_v10  ;;  %v823_v10 = vld [vmem:[#allocation8] sm:$0xff]  }
  0x52   :  { %710 = vmatpush3.bf16.msra.mxu1 %v810_v37 }
  0x53   :  { %325 = vmatpush1.bf16.msra.mxu0 %v774_v11  ;;  %711 = vmatprep.subr.bf16.mxu1 %v981_v35 }
  0x54   :  { %326 = vmatprep.subr.bf16.mxu0 %v775_v12 }
  0x56   :  { %712 = vmatpush3.bf16.msra.mxu1 %v811_v38 }
  0x57   :  { %327 = vmatpush1.bf16.msra.mxu0 %v777_v13  ;;  %713 = vmatprep.subr.bf16.mxu1 %v981_v35  ;;  %v136_v13 = vsub.s32 0, %v135_v44 }
  0x58   :  { %328 = vmatprep.subr.bf16.mxu0 %v778_v14 }
  0x5a   :  { %714 = vmatpush3.bf16.msra.mxu1 %v812_v39 }
  0x5b   :  { %329 = vmatpush1.bf16.msra.mxu0 %v780_v16  ;;  %715 = vmatprep.subr.bf16.mxu1 %v981_v35  ;;  %v137_v16 = vrot.slane %v132_v46, %v136_v13 }
  0x5c   :  { %330 = vmatprep.subr.bf16.mxu0 %v781_v17 }
  0x5e   :  { %716 = vmatpush3.bf16.msra.mxu1 %v813_v40 }
  0x5f   :  { %331 = vmatpush2.bf16.msra.mxu0 %v783_v18  ;;  %717 = vmatprep.subr.bf16.mxu1 %v981_v35 }
  0x60   :  { %332 = vmatprep.subr.bf16.mxu0 %v784_v19 }
  0x62   :  { %718 = vmatpush3.bf16.msra.mxu1 %v814_v41 }
  0x63   :  { %333 = vmatpush2.bf16.msra.mxu0 %v786_v20  ;;  %719 = vmatprep.subr.bf16.mxu1 %v981_v35 }
  0x64   :  { %334 = vmatprep.subr.bf16.mxu0 %v787_v21 }
  0x66   :  { %720 = vmatpush3.bf16.msra.mxu1 %v815_v42 }
  0x67   :  { %335 = vmatpush2.bf16.msra.mxu0 %v789_v22  ;;  %725 = vmatprep.subr.bf16.mxu1 %v981_v35 }
  0x68   :  { %336 = vmatprep.subr.bf16.mxu0 %v790_v23  ;;  %v686_v23 = vld [vmem:[%s1106_s6] ss:$0 sm:$0xff]  ;;  %s983_s6 = smov [#allocation11]  }
  0x69   :  { %s618_s28 = sshll.u32 %s983_s6, 4  ;;  %s619_s28 = int_to_ptr.vmem [resolvable:$true] %s618_s28 }
  0x6a   :  { %s944_s8 = scalar_lea.vmem %s619_s28, 256  ;;  %p949_p12 = scmp.lt.s32.totalorder %s619_s28, %s619_s28 }
  0x6b   :  { %337 = vmatpush2.bf16.msra.mxu0 %v792_v24  ;;  %p945_p11 = scmp.ne.s32.totalorder %s619_s28, %s944_s8  ;;  %p950_p13 = scmp.lt.s32.totalorder %s944_s8, %s944_s8 }
  0x6c   :  { %338 = vmatprep.subr.bf16.mxu0 %v793_v25 }
  0x6d   :  { %p951_p0 = por %p950_p13, %p949_p12 }
  0x6f   :  { %339 = vmatpush2.bf16.msra.mxu0 %v795_v26  ;;  %p952_p1 = pnand %p951_p0, %p945_p11 }
  0x70   :  { %340 = vmatprep.subr.bf16.mxu0 %v796_v27 }
  0x73   :  { %341 = vmatpush2.bf16.msra.mxu0 %v798_v28 }
  0x74   :  { %342 = vmatprep.subr.bf16.mxu0 %v799_v29 }
  0x77   :  { %343 = vmatpush2.bf16.msra.mxu0 %v801_v30 }
  0x78   :  { %344 = vmatprep.subr.bf16.mxu0 %v802_v31 }
  0x7b   :  { %345 = vmatpush2.bf16.msra.mxu0 %v804_v32 }
  0x7e   :  { %347 = vmatmul.mubr.bf16.vlgmr.msra.gmra.mxu0 %v1054_v33 }
 0x13e   :  { %v348_v48 = vpop.f32.mrf.mxu0 }
 0x13f   :  { %v349_v17 = vadd.f32 %v348_v48, %v137_v16 }
 0x140   :  { %v350_v49 = vpop.f32.mrf.mxu0 }
 0x141   :  { %v351_v50 = vadd.f32 %v350_v49, %v141_v47  ;;  %v666_v18 = vmul.f32 -1.442695, %v349_v17 }
 0x142   :  { %v352_v51 = vpop.f32.mrf.mxu0 }
 0x143   :  { %v667_v52 = vmul.f32 -1.442695, %v351_v50  ;;  %v353_v19 = vadd.f32 %v352_v51, %v137_v16 }
 0x144   :  { %v354_v53 = vpop.f32.mrf.mxu0 }
 0x145   :  { %824 = vpow2.f32 %v667_v52  ;;  %v355_v54 = vadd.f32 %v354_v53, %v141_v47  ;;  %v668_v20 = vmul.f32 -1.442695, %v353_v19 }
 0x147   :  { %v669_v55 = vmul.f32 -1.442695, %v355_v54 }
 0x149   :  { %826 = vpow2.f32 %v669_v55 }
 0x152   :  { %v825_v56 = vpop.eup %824 }
 0x153   :  { %v370_v57 = vadd.f32 1.0, %v825_v56 }
 0x155   :  { %828 = vrcp.f32 %v370_v57 }
 0x156   :  { %v827_v58 = vpop.eup %826 }
 0x157   :  { %v372_v59 = vadd.f32 1.0, %v827_v58 }
 0x159   :  { %830 = vrcp.f32 %v372_v59 }
 0x15a   :  { %832 = vpow2.f32 %v666_v18 }
 0x15b   :  { %834 = vpow2.f32 %v668_v20 }
 0x162   :  { %v829_v60 = vpop.eup %828 }
 0x163   :  { %v381_v0 = vmul.f32 %v829_v60, %v1071_v61 }
 0x166   :  { %v831_v63 = vpop.eup %830 }
 0x167   :  { %v382_v1 = vmul.f32 %v831_v63, %v1073_v62  ;;  %v833_v21 = vpop.eup %832 }
 0x168   :  { %v369_v26 = vadd.f32 1.0, %v833_v21  ;;  %v835_v28 = vpop.eup %834 }
 0x169   :  { %v383_v3 = vpack.c.bf16 %v382_v1, %v381_v0  ;;  %v371_v32 = vadd.f32 1.0, %v835_v28 }
 0x16b   :  { %722 = vmatmul.mubr.bf16.vlgmr.msra.gmra.mxu1 %v383_v3 }
 0x16c   :  { %726 = vmatpush3.bf16.msra.mxu1 %v816_v2  ;;  %741 = vmatprep.mubr.msk.bf16.mxu1 %vm982_vm0, %v981_v35 }
 0x16d   :  { %727 = vmatprep.subr.bf16.mxu1 %v981_v35 }
 0x170   :  { %728 = vmatpush3.bf16.msra.mxu1 %v817_v4 }
 0x171   :  { %729 = vmatprep.subr.bf16.mxu1 %v981_v35 }
 0x174   :  { %730 = vmatpush3.bf16.msra.mxu1 %v818_v5 }
 0x175   :  { %731 = vmatprep.subr.bf16.mxu1 %v981_v35 }
 0x178   :  { %732 = vmatpush3.bf16.msra.mxu1 %v819_v6 }
 0x179   :  { %733 = vmatprep.subr.bf16.mxu1 %v981_v35 }
 0x17c   :  { %734 = vmatpush3.bf16.msra.mxu1 %v820_v7 }
 0x17d   :  { %735 = vmatprep.subr.bf16.mxu1 %v981_v35 }
 0x180   :  { %736 = vmatpush3.bf16.msra.mxu1 %v821_v8 }
 0x181   :  { %737 = vmatprep.subr.bf16.mxu1 %v981_v35 }
 0x184   :  { %738 = vmatpush3.bf16.msra.mxu1 %v822_v9 }
 0x185   :  { %739 = vmatprep.subr.bf16.mxu1 %v981_v35 }
 0x188   :  { %740 = vmatpush3.bf16.msra.mxu1 %v823_v10 }
 0x18b   :  { %742 = vmatmul.mubr.bf16.vlgmr.msra.gmra.mxu1 %v1054_v33 }
 0x22b   :  { %v498_v11 = vpop.f32.mrf.mxu1 }
 0x22d   :  { %v723_v12 = vpop.f32.mrf.mxu1 }
 0x22f   :  { %v501_v14 = vpop.f32.mrf.mxu1 }
 0x231   :  { %v724_v15 = vpop.f32.mrf.mxu1 }
 0x24b   :  { %v587_v22 = vpop.f32.mrf.mxu1 }
 0x24c   :  { %v588_v24 = vadd.f32 %v587_v22, %v498_v11 }
 0x24d   :  { %v743_v25 = vpop.f32.mrf.mxu1 }
 0x24e   :  { %v601_v27 = vadd.f32 %v686_v23, %v588_v24 }
 0x24f   :  { %v590_v29 = vpop.f32.mrf.mxu1 }
 0x250   :  { %836 = vtanh.f32 %v601_v27  ;;  %v591_v30 = vadd.f32 %v590_v29, %v501_v14 }
 0x251   :  { %v744_v31 = vpop.f32.mrf.mxu1  ;;  %838 = vrcp.f32 %v369_v26 }
 0x252   :  { %v602_v33 = vadd.f32 %v686_v23, %v591_v30 }
 0x254   :  { %840 = vtanh.f32 %v602_v33 }
 0x255   :  { %842 = vrcp.f32 %v371_v32 }
 0x25d   :  { %v837_v34 = vpop.eup %836 }
 0x25e   :  { %v605_v35 = vsub.f32 %v837_v34, %v1071_v61  ;;  %v839_v36 = vpop.eup %838 }
 0x260   :  { %v607_v37 = vmul.f32 %v839_v36, %v605_v35 }
 0x261   :  { %v841_v38 = vpop.eup %840 }
 0x262   :  { %v606_v39 = vsub.f32 %v841_v38, %v1073_v62  ;;  %v609_v40 = vadd.f32 %v607_v37, %v1071_v61  ;;  %v843_v41 = vpop.eup %842 }
 0x264   :  { %v608_v42 = vmul.f32 %v843_v41, %v606_v39  ;;  %611 = vst [vmem:[#allocation11] sm:$0xff] %v609_v40 }
 0x266   :  { %v610_v43 = vadd.f32 %v608_v42, %v1073_v62 }
 0x268   :  { %612 = vst [vmem:[#allocation11 + $0x8] sm:$0xff] %v610_v43 }
 0x269   :  { %955 = shalt.err (!%p952_p1)
}
 0x26a   :  { %624 = dma.vmem_to_hbm [thread:$0]  %s619_s28, 256, %s1107_s7, [#allocation4], %s974_s29, %s974_s29, %s975_s30  }
 0x26b   :  { %970 = dma.done.wait [#allocation4], 256  }
 0x26c   :  { %971 = vsyncadd [#allocation4], 4294967040 }
 0x26d   :  { %628 = vsyncpa [#allocation3], 1 }
 0x26e   :  { %629 = vsyncpa [#allocation6], 1 }
 0x26f   :  { %630 = vsyncpa [#allocation9], 1 }
 0x270   :  { %631 = vsyncpa [#allocation4], 1 }

</bundles_post_ra>
